<compile_context>
chip_gen: v5e
topology: v5e:2x2
jax: 0.10.0
libtpu: 0.0.40
codegen_flags: <defaults>
</compile_context>

<pallas_src>
import jax
import jax.numpy as jnp
from jax import lax
from jax.experimental import pallas as pl
from jax.experimental.pallas import tpu as pltpu

_LANE = 128
_SUBLANE = 8
_VMEM_LIMIT = 48 * 1024 * 1024   # safe on v7x (64 MiB/TC), generous on v5e/v6e
_VMEM_BUDGET = 40 * 1024 * 1024  # target working set, headroom under the limit


def _round_up(x, m):
    return ((x + m - 1) // m) * m


def _choose_tile_rows(tile_rows, rows, kcin, cout_p, out_itemsize):
    """Pick the row-tile size: >=2 tiles when possible (v7x 2nd TensorCore),
    capped by `tile_rows` and by the double-buffered VMEM budget."""
    tr = _round_up(min(tile_rows, max(_SUBLANE, -(-rows // 2))), _SUBLANE)

    def working_set(t):
        pass1 = (2 * t * kcin * 2          # xcol (bf16), double-buffered
                 + 2 * kcin * cout_p * 2   # weight (bf16), double-buffered
                 + 2 * t * cout_p * 2      # conv out (bf16), double-buffered
                 + 2 * 2 * cout_p * 4)     # stats (f32), double-buffered
        pass2 = (2 * t * cout_p * 2        # conv in (bf16)
                 + 2 * 2 * cout_p * 4      # scale + shift (f32)
                 + 2 * t * cout_p * out_itemsize)
        return max(pass1, pass2)

    while tr > _SUBLANE and working_set(tr) > _VMEM_BUDGET:
        tr = _round_up(tr // 2, _SUBLANE)
    return tr


def _conv_stats_kernel(xcol_ref, w_ref, conv_ref, stats_ref):
    """One MXU matmul per row tile + per-tile partial BN statistics.

    xcol_ref : (TR, K*Cin)     bf16 im2col'd input rows
    w_ref    : (K*Cin, Cout_p) bf16 flattened conv weight (tap-major)
    conv_ref : (TR, Cout_p)    bf16 conv output tile
    stats_ref: (2, Cout_p)     f32; row 0 = partial sum, row 1 = partial sum sq

    Padded im2col rows are all-zero (the conv bias is dropped), so their conv
    output is exactly zero and they contribute nothing to either partial sum;
    no validity mask is needed.
    """
    acc = jnp.dot(xcol_ref[...], w_ref[...],
                  preferred_element_type=jnp.float32)
    # BN statistics from the f32 accumulator, BEFORE the bf16 downcast.
    stats_ref[0:1, :] = jnp.sum(acc, axis=0, keepdims=True)
    stats_ref[1:2, :] = jnp.sum(acc * acc, axis=0, keepdims=True)
    conv_ref[...] = acc.astype(conv_ref.dtype)


def _bn_relu_kernel(conv_ref, scale_ref, shift_ref, o_ref):
    """Fused y = relu(conv * scale + shift) on one row tile."""
    y = conv_ref[...].astype(jnp.float32) * scale_ref[...] + shift_ref[...]
    o_ref[...] = jnp.maximum(y, 0.0).astype(o_ref.dtype)


def shortcut_layer(x_ncl, weight_oik, bias, gamma, beta, kernel_size,
                   eps=1e-5, tile_rows=1024):
    """Forward of ShortcutLayer (training-mode BatchNorm statistics).

    x_ncl      : (N, Cin, L)     PyTorch NCL layout
    weight_oik : (Cout, Cin, K)  PyTorch Conv1d weight layout
    bias       : (Cout,)         unused: a per-channel constant cancels exactly
                                 under training-mode BatchNorm mean subtraction
    gamma,beta : (Cout,)         BatchNorm affine parameters
    """
    del bias  # exact no-op on the forward activations before training-mode BN
    N, Cin, L = x_ncl.shape
    Cout, _, K = weight_oik.shape
    assert K == kernel_size

    left = (kernel_size - 1) // 2
    right = kernel_size // 2

    R = N * L
    KCin = K * Cin
    # Lane-pad Cout only when it is near/above the 128-lane width; for narrow
    # shortcut layers the pad inflates the conv intermediate (up to 128/Cout in
    # HBM traffic), which costs more than the masked stores it avoids.
    Cout_p = _round_up(Cout, _LANE) if Cout >= _LANE // 2 else Cout

    out_itemsize = jnp.dtype(x_ncl.dtype).itemsize
    TR = _choose_tile_rows(tile_rows, R, KCin, Cout_p, out_itemsize)
    num_tiles = -(-R // TR)
    R_p = num_tiles * TR

    # ---- layout glue: "same" pad + NCL->NLC + im2col over the K taps (bf16) --
    x_nlc = jnp.transpose(x_ncl, (0, 2, 1)).astype(jnp.bfloat16)     # (N,L,Cin)
    x_pad = jnp.pad(x_nlc, ((0, 0), (left, right), (0, 0)))          # (N,L+K-1,Cin)
    cols = jnp.concatenate([x_pad[:, t:t + L, :] for t in range(K)], axis=-1)
    xcol = cols.reshape(R, KCin)
    xcol = jnp.pad(xcol, ((0, R_p - R), (0, 0)))                     # (R_p, K*Cin)

    # Conv weight: (Cout, Cin, K) -> (K*Cin, Cout_p), tap-major to match xcol.
    w2 = jnp.transpose(weight_oik, (2, 1, 0)).reshape(KCin, Cout)
    w2 = jnp.pad(w2.astype(jnp.bfloat16), ((0, 0), (0, Cout_p - Cout)))

    cparams = pltpu.CompilerParams(dimension_semantics=("parallel",),
                                   vmem_limit_bytes=_VMEM_LIMIT)

    # ---- pass 1: conv (bf16 operands, f32 acc) + per-tile BN partials --------
    conv, stats = pl.pallas_call(
        _conv_stats_kernel,
        grid=(num_tiles,),
        in_specs=[
            pl.BlockSpec((TR, KCin), lambda i: (i, 0)),
            pl.BlockSpec((KCin, Cout_p), lambda i: (0, 0)),
        ],
        out_specs=(
            pl.BlockSpec((TR, Cout_p), lambda i: (i, 0)),
            pl.BlockSpec((None, 2, Cout_p), lambda i: (i, 0, 0)),
        ),
        out_shape=(
            jax.ShapeDtypeStruct((R_p, Cout_p), jnp.bfloat16),
            jax.ShapeDtypeStruct((num_tiles, 2, Cout_p), jnp.float32),
        ),
        compiler_params=cparams,
    )(xcol, w2)

    # ---- tiny glue: reduce partials, fold BN into per-channel scale/shift ----
    total = jnp.sum(stats[:, 0, :], axis=0)
    total_sq = jnp.sum(stats[:, 1, :], axis=0)
    cnt = jnp.float32(R)
    mean = total / cnt
    # One-pass biased variance in f32 (E[x^2] - mean^2); adequate for
    # activation-scale data.  TODO(synk): per-tile mean-shifted sums if
    # catastrophic cancellation ever matters on real data.
    var = jnp.maximum(total_sq / cnt - mean * mean, 0.0)
    inv = lax.rsqrt(var + eps)
    gamma_p = jnp.pad(gamma.astype(jnp.float32), (0, Cout_p - Cout))
    beta_p = jnp.pad(beta.astype(jnp.float32), (0, Cout_p - Cout))
    scale = (gamma_p * inv)[None, :]                        # (1, Cout_p)
    shift = (beta_p - mean * gamma_p * inv)[None, :]        # (1, Cout_p)

    # ---- pass 2: fused normalize + affine + ReLU -----------------------------
    out_p = pl.pallas_call(
        _bn_relu_kernel,
        grid=(num_tiles,),
        in_specs=[
            pl.BlockSpec((TR, Cout_p), lambda i: (i, 0)),
            pl.BlockSpec((1, Cout_p), lambda i: (0, 0)),
            pl.BlockSpec((1, Cout_p), lambda i: (0, 0)),
        ],
        out_specs=pl.BlockSpec((TR, Cout_p), lambda i: (i, 0)),
        out_shape=jax.ShapeDtypeStruct((R_p, Cout_p), x_ncl.dtype),
        compiler_params=cparams,
    )(conv, scale, shift)

    out = out_p[:R, :Cout].reshape(N, L, Cout)
    return jnp.transpose(out, (0, 2, 1))                    # back to (N, Cout, L)


def reference(x_ncl, weight_oik, bias, gamma, beta, kernel_size, eps=1e-5):
    """Pure-JAX f32 reference mirroring the PyTorch forward (training-mode BN)."""
    left = (kernel_size - 1) // 2
    right = kernel_size // 2
    xp = jnp.pad(x_ncl, ((0, 0), (0, 0), (left, right)))
    y = lax.conv_general_dilated(
        xp, weight_oik, window_strides=(1,), padding='VALID',
        dimension_numbers=('NCH', 'OIH', 'NCH'))
    y = y + bias[None, :, None]
    mean = jnp.mean(y, axis=(0, 2), keepdims=True)
    var = jnp.mean((y - mean) ** 2, axis=(0, 2), keepdims=True)
    yn = (y - mean) * lax.rsqrt(var + eps)
    yn = yn * gamma[None, :, None] + beta[None, :, None]
    return jnp.maximum(yn, 0.0)


if __name__ == "__main__":
    # Small shapes consistent with the module: batch=2, in_ch=4, out_ch=8,
    # seq length=16, kernel_size=3.
    N, Cin, Cout, L, K = 2, 4, 8, 16, 3

    key = jax.random.PRNGKey(0)
    kx, kw, kb = jax.random.split(key, 3)

    x = jax.random.normal(kx, (N, Cin, L), dtype=jnp.float32)

    # Conv1d-style init (uniform in +/- 1/sqrt(Cin*K)).
    bound = 1.0 / (Cin * K) ** 0.5
    weight = jax.random.uniform(kw, (Cout, Cin, K), jnp.float32, -bound, bound)
    bias = jax.random.uniform(kb, (Cout,), jnp.float32, -bound, bound)
    # BatchNorm1d default init: gamma=1, beta=0.
    gamma = jnp.ones((Cout,), jnp.float32)
    beta = jnp.zeros((Cout,), jnp.float32)

    out = shortcut_layer(x, weight, bias, gamma, beta, kernel_size=K)
    out = jax.block_until_ready(out)

    ref = reference(x, weight, bias, gamma, beta, kernel_size=K)
    assert out.shape == (N, Cout, L)
    # Tolerance reflects the deliberate bf16 matmul operands + bf16 conv
    # intermediate (~1e-3..1e-2 relative on normalized activations).
    assert jnp.allclose(out, ref, atol=5e-2, rtol=5e-2), (
        f"max abs err {jnp.max(jnp.abs(out - ref))}")

    print("KERNEL_OK")
</pallas_src>

<mosaic_0001>
module attributes {stable_mosaic.version = 11 : i64} {
  func.func @_conv_stats_kernel(%arg0: i32, %arg1: memref<16x12xbf16, #tpu.memory_space<vmem>>, %arg2: memref<12x8xbf16, #tpu.memory_space<vmem>>, %arg3: memref<16x8xbf16, #tpu.memory_space<vmem>>, %arg4: memref<1x2x8xf32, #tpu.memory_space<vmem>>) attributes {dimension_semantics = [#tpu.dimension_semantics<parallel>], iteration_bounds = array<i64: 2>, scalar_prefetch = 0 : i64, scratch_operands = 0 : i64, tpu.core_type = #tpu.core_type<tc>, window_params = [{transform_indices = @transform_0, window_bounds = array<i64: 16, 12>}, {pipeline_mode = #tpu.pipeline_mode<synchronous>, transform_indices = @transform_1, window_bounds = array<i64: 12, 8>}, {transform_indices = @transform_2, window_bounds = array<i64: 16, 8>}, {transform_indices = @transform_3, window_bounds = array<i64: 1, 2, 8>}]} {
    %c0 = arith.constant 0 : index
    %c0_0 = arith.constant 0 : index
    %0 = vector.load %arg1[%c0, %c0_0] : memref<16x12xbf16, #tpu.memory_space<vmem>>, vector<16x12xbf16>
    %c0_1 = arith.constant 0 : index
    %c0_2 = arith.constant 0 : index
    %1 = vector.load %arg2[%c0_1, %c0_2] : memref<12x8xbf16, #tpu.memory_space<vmem>>, vector<12x8xbf16>
    %cst = arith.constant dense<0.000000e+00> : vector<16x8xf32>
    %2 = tpu.matmul %0, %1, %cst {dimension_numbers = #tpu.dot_dimension_numbers<[1], [0], [0], [1], [0, 0, 1, 1], [], []>} : vector<16x12xbf16>, vector<12x8xbf16>, vector<16x8xf32> -> vector<16x8xf32>
    %cst_3 = arith.constant dense<0.000000e+00> : vector<8xf32>
    %3 = vector.multi_reduction <add>, %2, %cst_3 [0] : vector<16x8xf32> to vector<8xf32>
    %4 = vector.shape_cast %3 : vector<8xf32> to vector<1x8xf32>
    %c0_4 = arith.constant 0 : index
    %c0_5 = arith.constant 0 : index
    %c0_6 = arith.constant 0 : index
    %5 = vector.load %arg4[%c0_4, %c0_5, %c0_6] : memref<1x2x8xf32, #tpu.memory_space<vmem>>, vector<1x1x8xf32>
    %6 = vector.shape_cast %5 : vector<1x1x8xf32> to vector<1x8xf32>
    %7 = vector.shape_cast %4 : vector<1x8xf32> to vector<1x1x8xf32>
    tpu.vector_store %arg4[%c0_4, %c0_5, %c0_6], %7 {strides = array<i32>} : memref<1x2x8xf32, #tpu.memory_space<vmem>>, vector<1x1x8xf32>,
    %8 = arith.mulf %2, %2 : vector<16x8xf32>
    %cst_7 = arith.constant dense<0.000000e+00> : vector<8xf32>
    %9 = vector.multi_reduction <add>, %8, %cst_7 [0] : vector<16x8xf32> to vector<8xf32>
    %10 = vector.shape_cast %9 : vector<8xf32> to vector<1x8xf32>
    %c0_8 = arith.constant 0 : index
    %c1 = arith.constant 1 : index
    %c0_9 = arith.constant 0 : index
    %11 = vector.load %arg4[%c0_8, %c1, %c0_9] : memref<1x2x8xf32, #tpu.memory_space<vmem>>, vector<1x1x8xf32>
    %12 = vector.shape_cast %11 : vector<1x1x8xf32> to vector<1x8xf32>
    %13 = vector.shape_cast %10 : vector<1x8xf32> to vector<1x1x8xf32>
    tpu.vector_store %arg4[%c0_8, %c1, %c0_9], %13 {strides = array<i32>} : memref<1x2x8xf32, #tpu.memory_space<vmem>>, vector<1x1x8xf32>,
    %14 = arith.truncf %2 : vector<16x8xf32> to vector<16x8xbf16>
    %c0_10 = arith.constant 0 : index
    %c0_11 = arith.constant 0 : index
    %15 = vector.load %arg3[%c0_10, %c0_11] : memref<16x8xbf16, #tpu.memory_space<vmem>>, vector<16x8xbf16>
    tpu.vector_store %arg3[%c0_10, %c0_11], %14 {strides = array<i32>} : memref<16x8xbf16, #tpu.memory_space<vmem>>, vector<16x8xbf16>,
    return
  }
  func.func @transform_0(%arg0: i32) -> (i32, i32) {
    %c0_i32 = arith.constant 0 : i32
    %c0_i32_0 = arith.constant 0 : i32
    return %arg0, %c0_i32 : i32, i32
  }
  func.func @transform_1(%arg0: i32) -> (i32, i32) {
    %c0_i32 = arith.constant 0 : i32
    %c0_i32_0 = arith.constant 0 : i32
    %c0_i32_1 = arith.constant 0 : i32
    return %c0_i32, %c0_i32_0 : i32, i32
  }
  func.func @transform_2(%arg0: i32) -> (i32, i32) {
    %c0_i32 = arith.constant 0 : i32
    %c0_i32_0 = arith.constant 0 : i32
    return %arg0, %c0_i32 : i32, i32
  }
  func.func @transform_3(%arg0: i32) -> (i32, i32, i32) {
    %c0_i32 = arith.constant 0 : i32
    %c0_i32_0 = arith.constant 0 : i32
    %c0_i32_1 = arith.constant 0 : i32
    return %arg0, %c0_i32, %c0_i32_0 : i32, i32, i32
  }
}

</mosaic_0001>

<bundles_post_ra>
// kernel: tpu_custom_call.1
= control target key start
LH: loop header
LB: loop body
LE: loop exit
PB: predicated region body
PF: predicated region fallthrough
CT: control target
= control target key end

     0   :  { %9 = vsyncpa [#allocation3], 0  ;;  %s600_s0 = inlined_call_operand.vmem [shape: bf16[32,12], index: 0, kind: input, shape index: {}]   ;;  %s601_s1 = inlined_call_operand.vmem [shape: bf16[12,8], index: 1, kind: input, shape index: {}]   ;;  %s602_s2 = inlined_call_operand.vmem [shape: bf16[32,8], index: 2, kind: output, shape index: {0}]   ;;  %s603_s3 = inlined_call_operand.hbm [shape: f32[2,2,8], index: 3, kind: output, shape index: {1}]  }
   0x1   :  { %11 = vsyncpa [#allocation3 + $0x1], 0  ;;  %s507_s12 = smov 0   ;;  %s509_s13 = smov 0  }
   0x2   :  { %s511_s14 = smov 0   ;;  %s513_s15 = smov 0  }
   0x3 LB: > { %s359_s16 = sadd.s32 4294967295, %s485_s15   ;;  %s360_s17 = sadd.s32 4294967294, %s485_s15   ;;  %s485_s15 = sphi %s513_s15, %s609_s15   ;;  %s481_s14 = sphi %s511_s14, %s608_s14   ;;  %s477_s13 = sphi %s509_s13, %s607_s13   ;;  %s473_s12 = sphi %s507_s12, %s606_s12  }
   0x4   : > { %s530_s18 = sadd.s32 1, %s485_s15   ;;  %s97_s19 = sadd.s32 1, %s481_s14 }
   0x5   : > { %s94_s20 = ssub.s32 %s485_s15, %s530_s18  ;;  %p107_p0 = scmp.ne.s32.totalorder %s481_s14, %s477_s13 }
   0x6   : > { %p95_p1 = scmp.eq.s32.totalorder %s94_s20, 0  ;;  %p108_p2 = scmp.eq.s32.totalorder %s359_s16, 1 }
   0x7   : > { %p113_p3 = scmp.ne.s32.totalorder %s477_s13, %s473_s12  ;;  %p114_p4 = scmp.eq.s32.totalorder %s360_s17, 1 }
   0x8   : > { %s540_s21 = scalar_select %p95_p1, %s481_s14, %s97_s19  }
   0x9   : > { %p542_p5 = por %p108_p2, %p107_p0  ;;  %p546_p6 = por %p114_p4, %p113_p3 }
   0xa   : > { %p363_p7 = scmp.ge.s32.totalorder %s485_s15, 1  ;;  %p144_p8 = scmp.lt.s32.totalorder %s485_s15, 3 }
   0xc   : > { %p145_p9 = pnand %p363_p7, %p144_p8 }
   0xd   : > { %s558_s28 = sshll.u32 (!%p145_p9), %s359_s16, 1  ;;  %s170_s10 = sand.u32 (!%p145_p9), 1, %s477_s13  }
   0xe   : > { %148 = sbr.rel (%p145_p9) target bundleno = 180 (0xb4), region = 28  ;;  %p174_p10 = scmp.lt.s32.totalorder (!%p145_p9), %s558_s28, 3 }
   0xf   : > { %s364_s11 = sshll.u32 (!%p145_p9), %s170_s10, 1  ;;  %s271_s19 = scalar_lea.hbm (!%p145_p9), %s603_s3, %s558_s28 }
  0x10   : > { %s172_s20 = scalar_lea.vmem (!%p145_p9), [#allocation2], %s364_s11  ;;  %s275_s25 = sshll.u32 (!%p145_p9), %s271_s19, 4  ;;  %s276_s25 = int_to_ptr.hbm [resolvable:$true] %s275_s25 }
  0x11   : > { %s273_s24 = sshll.u32 (!%p145_p9), %s172_s20, 4  ;;  %s257_s26 = scalar_lea.sflag (!%p145_p9), [#allocation3], %s170_s10  ;;  %s274_s24 = int_to_ptr.vmem [resolvable:$true] %s273_s24 }
  0x12   : > { %s437_s27 = sshra.s32 (!%p145_p9), %s276_s25, 4  ;;  %s443_s4 = scalar_lea.hbm (!%p145_p9), %s603_s3, 4  ;;  %s438_s27 = int_to_ptr.hbm [resolvable:$true] %s437_s27 }
  0x13   : > { %v375_v0 = vld [vmem:[%s601_s1] sm:$0xf]  ;;  %v383_v1 = vld [vmem:[%s601_s1] sm:$0x30]  ;;  %vm204_vm0 = vcmask 1045504   ;;  %s175_s29 = scalar_select %p174_p10, %s558_s28, 3 }
  0x14   : > { %v376_v2 = vor.u32 %v383_v1, %v375_v0  ;;  %vm200_vm1 = vcmask 97280   ;;  %vm248_vm2 = vcmask 60416   ;;  %vm222_vm3 = vcmask 64512   ;;  %p444_p0 = scmp.lt.s32.totalorder %s438_s27, %s603_s3 }
  0x15   : > { %s366_s30 = sshll.u32 %s175_s29, 2  ;;  %vm232_vm4 = vcmask 57344   ;;  %s439_s29 = scalar_lea.hbm %s438_s27, 2 }
  0x16   : > { %v206_v3 = vsel %vm204_vm0, %v376_v2, 0  ;;  %s177_s6 = scalar_lea.vmem %s600_s0, %s366_s30  ;;  %s183_s9 = scalar_lea.vmem %s602_s2, %s366_s30 }
  0x17   : > { %215 = vmatpush.bf16.msra.mxu0 %v206_v3  ;;  %v382_v4 = vld [vmem:[%s177_s6] sm:$0xff]  ;;  %p440_p11 = scmp.ne.s32.totalorder %s438_s27, %s439_s29  ;;  %p445_p1 = scmp.lt.s32.totalorder %s443_s4, %s439_s29 }
  0x19   : > { %p441_p12 = pnand %p440_p11, %p542_p5  ;;  %p446_p2 = por %p445_p1, %p444_p0 }
  0x1a   : > { %377 = vmatmul.msk.bf16.vlgmr.msra.gmra.mxu0 %vm200_vm1, %v382_v4 }
  0x1b   : > { %p442_p13 = pneg %p441_p12 }
  0x1d   : > { %p447_p3 = pnand %p446_p2, %p442_p13 }
  0x97   : > { %v217_v5 = vpop.f32.mrf.mxu0 }
  0x98   : > { %v246_v6 = vpack.c.bf16 %v217_v5, %v217_v5  ;;  %v234_v7 = vmul.f32 %v217_v5, %v217_v5  ;;  %v223_v9 = vsel %vm222_vm3, %v217_v5, 0.0 }
  0x9a   : > { %249 = vst.msk [vmem:[%s183_s9] sm:$0xf] %vm248_vm2, %v246_v6  ;;  %v236_v14 = vsel %vm222_vm3, %v234_v7, 0.0 }
  0x9f   : > { %v219_v8 = vpop.f32.mrf.mxu0 }
  0xa0   : > { %v224_v10 = vsel %vm222_vm3, %v219_v8, 0.0  ;;  %v235_v11 = vmul.f32 %v219_v8, %v219_v8  ;;  %v247_v12 = vpack.c.bf16 %v219_v8, %v219_v8 }
  0xa1   : > { %v225_v13 = vadd.f32 %v224_v10, %v223_v9 }
  0xa2   : > { %v237_v15 = vsel %vm222_vm3, %v235_v11, 0.0  ;;  %250 = vst.msk [vmem:[%s183_s9 + $0x4] sm:$0xf] %vm248_vm2, %v247_v12 }
  0xa3   : > { %v226_v16 = vrot.slane %v225_v13, 4  ;;  %v238_v17 = vadd.f32 %v237_v15, %v236_v14 }
  0xa5   : > { %v227_v18 = vadd.f32 %v226_v16, %v225_v13  ;;  %v239_v19 = vrot.slane %v238_v17, 4 }
  0xa7   : > { %v228_v20 = vrot.slane %v227_v18, 2  ;;  %v240_v21 = vadd.f32 %v239_v19, %v238_v17 }
  0xa9   : > { %v229_v22 = vadd.f32 %v228_v20, %v227_v18  ;;  %v241_v23 = vrot.slane %v240_v21, 2 }
  0xab   : > { %v230_v24 = vrot.slane %v229_v22, 1  ;;  %v242_v25 = vadd.f32 %v241_v23, %v240_v21 }
  0xad   : > { %v231_v26 = vadd.f32 %v230_v24, %v229_v22  ;;  %v243_v27 = vrot.slane %v242_v25, 1 }
  0xaf   : > { %233 = vst.msk [vmem:[%s172_s20] sm:$0x1] %vm232_vm4, %v231_v26  ;;  %v244_v28 = vadd.f32 %v243_v27, %v242_v25 }
  0xb1   : > { %245 = vst.msk [vmem:[%s172_s20 + $0x1] sm:$0x1] %vm232_vm4, %v244_v28 }
  0xb2   : > { %450 = shalt.err (!%p447_p3)
}
  0xb3   : > { %384 = dma.vmem_to_hbm [thread:$0]  (%p542_p5), %s274_s24, 32, %s276_s25, %s257_s26  }
  0xb4 PF: > { %p390_p4 = scmp.ge.s32.totalorder %s485_s15, 2  ;;  %s295_s7 = sand.u32 1, %s473_s12  }
  0xb5   : > { %s296_s8 = scalar_lea.sflag [#allocation3], %s295_s7 }
  0xb6   : > { %p387_p7 = pnand %p390_p4, %p546_p6 }
  0xb8   : > { %p388_p8 = pneg %p387_p7 }
  0xba   : > { %468 = dma.done.wait (%p388_p8), %s296_s8, 32  }
  0xbb   : > { %470 = vsyncadd (%p388_p8), %s296_s8, 4294967264  ;;  %p14_p9 = scmp.ge.s32.totalorder %s530_s18, 4   ;;  %s606_s12 = smov %s477_s13 }
  0xbc   : > { %s607_s13 = smov %s481_s14  ;;  %s608_s14 = smov %s540_s21 }
  0xbd   : > { %s609_s15 = smov %s530_s18  ;;  %16 = sbr.rel (!%p14_p9) target bundleno = 3 (0x3), region = 75 }
  0xc2   :  { %302 = vsyncpa [#allocation3], 1 }
  0xc3   :  { %304 = vsyncpa [#allocation3 + $0x1], 1 }

</bundles_post_ra>
